<compile_context>
chip_gen: v7x
topology: tpu7x:2x2x1
jax: 0.10.0
libtpu: 0.0.40
codegen_flags: <defaults>
</compile_context>

<pallas_src>
import types

import jax
import jax.numpy as jnp
from jax.experimental import pallas as pl
from jax.experimental.pallas import tpu as pltpu


# ---------------------------------------------------------------------------
# VMEM budget (derived from the chip; falls back to v7x-safe numbers)
# ---------------------------------------------------------------------------

def _vmem_budget():
    cap = 64 * 1024 * 1024
    try:
        info = pltpu.get_tpu_info()
        cap = getattr(info, "vmem_capacity_bytes", cap) or cap
    except Exception:
        pass
    limit = min(cap // 2, 64 * 1024 * 1024)   # scoped limit with headroom
    # per-grid-step budget across ALL streamed inputs; x2 pipeline buffers < limit/2
    return limit // 4, limit


_TARGET_TILE_BYTES, _VMEM_LIMIT_BYTES = _vmem_budget()


def _compiler_params():
    # grid = (shard, feature_tile): shard is independent (megacore on v7x),
    # feature_tile is the reduction axis (output block revisited) -> arbitrary.
    return pltpu.CompilerParams(
        dimension_semantics=("parallel", "arbitrary"),
        vmem_limit_bytes=_VMEM_LIMIT_BYTES,
    )


# ---------------------------------------------------------------------------
# Trace-time tiling plan + layout helpers
# ---------------------------------------------------------------------------

def _round_up(x, m):
    return ((x + m - 1) // m) * m


def _plan(n_chunks, rows_per_chunk, itemsize):
    """Pick (tile_rows, tiles_per_shard, n_shards, padded_chunks).

    n_chunks        : number of 128-lane feature chunks actually needed.
    rows_per_chunk  : (1,128) rows DMA'd per chunk summed over all streamed inputs,
                      so one pipeline buffer set costs tile_rows*rows_per_chunk*128*B.
    """
    bytes_per_chunk = rows_per_chunk * 128 * itemsize
    max_rows = max(8, (_TARGET_TILE_BYTES // max(1, bytes_per_chunk)) // 8 * 8)
    tile_rows = min(max_rows, _round_up(n_chunks, 8))      # multiple of 8 (sublane)
    n_tiles = -(-n_chunks // tile_rows)                     # cdiv; last tile zero-padded
    if n_tiles % 2 == 0:
        n_shards, tiles_per_shard = 2, n_tiles // 2         # v7x megacore split
    else:
        n_shards, tiles_per_shard = 1, n_tiles
    return tile_rows, tiles_per_shard, n_shards, n_tiles * tile_rows


def _to_chunks(x2d, padded_chunks):
    """(R, F) -> (R, padded_chunks, 128); zero-pads F (sum-neutral for all kernels)."""
    r, f = x2d.shape
    fp = padded_chunks * 128
    if fp != f:
        x2d = jnp.pad(x2d, ((0, 0), (0, fp - f)))
    return x2d.reshape(r, padded_chunks, 128)


def _acc_shape(n_shards):
    return jax.ShapeDtypeStruct((n_shards, 8, 128), jnp.float32)


def _acc_spec():
    # Lane-dense (8,128) accumulator block, resident across the reduction axis,
    # indexed only by the (parallel) shard axis.
    return pl.BlockSpec((1, 8, 128), lambda s, t: (s, 0, 0))


def _x_spec(rows, tile_rows, tiles_per_shard):
    return pl.BlockSpec((rows, tile_rows, 128),
                        lambda s, t: (0, s * tiles_per_shard + t, 0))


# ---------------------------------------------------------------------------
# Kernels
# ---------------------------------------------------------------------------

def _fold8(x):
    """Sum an f32 (..., 128) tile with an 8-divisible row count down to (8,128)
    using only sublane-aligned vreg adds (no cross-lane XLU work, no scalar store)."""
    return jnp.sum(x.reshape(-1, 8, 128), axis=0)


def _adv_d_kernel(p_ref, t_ref, w_ref, adv_ref, wsq_ref):
    """adv += sum((pred - target) * w_pred); wsq += sum(disc_w^2) (full weight)."""
    @pl.when(pl.program_id(1) == 0)
    def _():
        adv_ref[...] = jnp.zeros_like(adv_ref)
        wsq_ref[...] = jnp.zeros_like(wsq_ref)
    p = p_ref[...].astype(jnp.float32)          # (B, tr, 128)
    t = t_ref[...].astype(jnp.float32)
    w = w_ref[...].astype(jnp.float32)          # (g, tr, 128); [0]=pred half, [1]=img half
    adv_ref[...] += _fold8((p - t) * w[0])[None]
    wsq_ref[...] += _fold8(w * w)[None]


def _g_kernel(p_ref, t_ref, w_ref, adv_ref, l1_ref, sq_ref):
    """Single pass: critic partial <w_pred, pred>, L1 sum, squared-error sum."""
    @pl.when(pl.program_id(1) == 0)
    def _():
        adv_ref[...] = jnp.zeros_like(adv_ref)
        l1_ref[...] = jnp.zeros_like(l1_ref)
        sq_ref[...] = jnp.zeros_like(sq_ref)
    p = p_ref[...].astype(jnp.float32)
    t = t_ref[...].astype(jnp.float32)
    w = w_ref[...].astype(jnp.float32)
    d = p - t
    adv_ref[...] += _fold8(p * w[0])[None]
    l1_ref[...] += _fold8(jnp.abs(d))[None]
    sq_ref[...] += _fold8(d * d)[None]


def _g_kernel_cond(p_ref, t_ref, i_ref, w_ref, adv_ref, l1_ref, sq_ref):
    """Conditional variant: critic partial includes the img * w_img term (fused)."""
    @pl.when(pl.program_id(1) == 0)
    def _():
        adv_ref[...] = jnp.zeros_like(adv_ref)
        l1_ref[...] = jnp.zeros_like(l1_ref)
        sq_ref[...] = jnp.zeros_like(sq_ref)
    p = p_ref[...].astype(jnp.float32)
    t = t_ref[...].astype(jnp.float32)
    im = i_ref[...].astype(jnp.float32)
    w = w_ref[...].astype(jnp.float32)          # (2, tr, 128)
    d = p - t
    adv_ref[...] += _fold8(p * w[0] + im * w[1])[None]
    l1_ref[...] += _fold8(jnp.abs(d))[None]
    sq_ref[...] += _fold8(d * d)[None]


def _sq_kernel(p_ref, t_ref, sq_ref):
    """sum((pred - target)^2) over dense chunk tiles (eval MSE)."""
    @pl.when(pl.program_id(1) == 0)
    def _():
        sq_ref[...] = jnp.zeros_like(sq_ref)
    d = p_ref[...].astype(jnp.float32) - t_ref[...].astype(jnp.float32)
    sq_ref[...] += _fold8(d * d)[None]


# ---------------------------------------------------------------------------
# pallas_call wrappers
# ---------------------------------------------------------------------------

def _d_phase_call(pred_c, target_c, w_c, tile_rows, tiles_per_shard, n_shards):
    b = pred_c.shape[0]
    g = w_c.shape[0]
    x_spec = _x_spec(b, tile_rows, tiles_per_shard)
    w_spec = _x_spec(g, tile_rows, tiles_per_shard)
    adv, wsq = pl.pallas_call(
        _adv_d_kernel,
        out_shape=(_acc_shape(n_shards), _acc_shape(n_shards)),
        grid=(n_shards, tiles_per_shard),
        in_specs=[x_spec, x_spec, w_spec],
        out_specs=(_acc_spec(), _acc_spec()),
        compiler_params=_compiler_params(),
    )(pred_c, target_c, w_c)
    return jnp.sum(adv), jnp.sum(wsq)


def _g_phase_call(pred_c, target_c, img_c, w_c, tile_rows, tiles_per_shard, n_shards):
    b = pred_c.shape[0]
    g = w_c.shape[0]
    x_spec = _x_spec(b, tile_rows, tiles_per_shard)
    w_spec = _x_spec(g, tile_rows, tiles_per_shard)
    outs = (_acc_shape(n_shards),) * 3
    out_specs = (_acc_spec(), _acc_spec(), _acc_spec())
    if img_c is None:
        adv, l1, sq = pl.pallas_call(
            _g_kernel, out_shape=outs, grid=(n_shards, tiles_per_shard),
            in_specs=[x_spec, x_spec, w_spec], out_specs=out_specs,
            compiler_params=_compiler_params(),
        )(pred_c, target_c, w_c)
    else:
        adv, l1, sq = pl.pallas_call(
            _g_kernel_cond, out_shape=outs, grid=(n_shards, tiles_per_shard),
            in_specs=[x_spec, x_spec, x_spec, w_spec], out_specs=out_specs,
            compiler_params=_compiler_params(),
        )(pred_c, target_c, img_c, w_c)
    return jnp.sum(adv), jnp.sum(l1), jnp.sum(sq)


def _mse_sum_call(pred_c, target_c, tile_rows, tiles_per_shard, n_shards):
    b = pred_c.shape[0]
    x_spec = _x_spec(b, tile_rows, tiles_per_shard)
    sq = pl.pallas_call(
        _sq_kernel, out_shape=_acc_shape(n_shards), grid=(n_shards, tiles_per_shard),
        in_specs=[x_spec, x_spec], out_specs=_acc_spec(),
        compiler_params=_compiler_params(),
    )(pred_c, target_c)
    return jnp.sum(sq)


# ---------------------------------------------------------------------------
# LossGAN (forward-pass port of the PyTorch module)
# ---------------------------------------------------------------------------

class LossGAN:
    def __init__(self, args):
        self.mode = args.mode
        self.args = args
        self.perceptual_loss = bool(args.perceptual_loss)
        # TODO(synk): the pretrained resnet34 perceptual branch has no in-script
        # Pallas equivalent; perceptual_loss must stay False here.
        assert not self.perceptual_loss
        self._conditional = self.mode in ('conditional_gan', 'flownet')

    def forward(self, phase, disc_w, img, pred, target, epoch_id, rng_key=None):
        # rng_key accepted for interface parity; the alpha/interpolation path
        # contributes nothing to the returned losses for a linear critic.
        del rng_key
        B = target.shape[0]
        itemsize = pred.dtype.itemsize

        if phase == 'D':
            pred_flat = pred.reshape(B, -1)
            target_flat = target.reshape(B, -1)
            Fp = pred_flat.shape[1]
            # torch.cat((pred, img), dim=1).view(B,-1) puts pred features first:
            # disc_w[:, :Fp] multiplies pred/target, disc_w[:, Fp:] multiplies img.
            halves = [disc_w[:, :Fp], disc_w[:, Fp:]] if self._conditional else [disc_w]
            g = len(halves)
            max_f = max([Fp] + [h.shape[1] for h in halves])
            n_chunks = -(-max_f // 128)
            tile_rows, tps, n_shards, padded_chunks = _plan(n_chunks, 2 * B + g, itemsize)

            pred_c = _to_chunks(pred_flat, padded_chunks)
            target_c = _to_chunks(target_flat, padded_chunks)
            w_c = jnp.concatenate([_to_chunks(h, padded_chunks) for h in halves], axis=0)

            adv_sum, wsq = _d_phase_call(pred_c, target_c, w_c, tile_rows, tps, n_shards)
            # img part of the conditional critic cancels in adv_D -> img never read.
            adv_D_loss = adv_sum / B
            # Linear critic: dD/dx = disc_w for every sample; torch.norm(dxdD, p=2) is
            # the GLOBAL Frobenius norm of the (B, F) broadcast => sqrt(B)*||disc_w||_F.
            # TODO(synk): valid only for a linear, bias-free Discriminator; a nonlinear
            # critic would need jax.grad through a real forward over interpolated_x.
            gp_loss = (jnp.sqrt(B * wsq) - 1.0) ** 2
            return adv_D_loss, gp_loss, None

        elif phase == 'G':
            pred_flat = pred.reshape(B, -1)
            target_flat = target.reshape(B, -1)
            Fp = pred_flat.shape[1]
            n_elem = pred_flat.size
            if self._conditional:
                img_flat = img.reshape(B, -1)
                halves = [disc_w[:, :Fp], disc_w[:, Fp:]]
                max_f = max(Fp, img_flat.shape[1])
                rows_per_chunk = 3 * B + 2
            else:
                img_flat = None
                halves = [disc_w]
                max_f = Fp
                rows_per_chunk = 2 * B + 1
            n_chunks = -(-max_f // 128)
            tile_rows, tps, n_shards, padded_chunks = _plan(n_chunks, rows_per_chunk,
                                                            itemsize)

            pred_c = _to_chunks(pred_flat, padded_chunks)
            target_c = _to_chunks(target_flat, padded_chunks)
            img_c = _to_chunks(img_flat, padded_chunks) if img_flat is not None else None
            w_c = jnp.concatenate([_to_chunks(h, padded_chunks) for h in halves], axis=0)

            adv_sum, l1_sum, sq_sum = _g_phase_call(pred_c, target_c, img_c, w_c,
                                                    tile_rows, tps, n_shards)
            adv_G_loss = -adv_sum / B
            if epoch_id < self.args.epochs // 4:
                pixel_loss = l1_sum / n_elem        # nn.L1Loss (mean)
            else:
                pixel_loss = sq_sum / n_elem        # nn.MSELoss (mean)
            perceptual_loss = 0                     # disabled (see __init__ TODO)
            return adv_G_loss, pixel_loss, perceptual_loss

        else:  # eval
            p2 = pred.reshape(1, -1)
            t2 = target.reshape(1, -1)
            n_elem = p2.size
            n_chunks = -(-n_elem // 128)
            tile_rows, tps, n_shards, padded_chunks = _plan(n_chunks, 2, itemsize)
            pred_c = _to_chunks(p2, padded_chunks)
            target_c = _to_chunks(t2, padded_chunks)
            sq_sum = _mse_sum_call(pred_c, target_c, tile_rows, tps, n_shards)
            return sq_sum / n_elem


# ---------------------------------------------------------------------------
# Main
# ---------------------------------------------------------------------------

if __name__ == "__main__":
    B, C, H, W = 2, 4, 16, 16
    key = jax.random.PRNGKey(0)
    k_img, k_pred, k_tgt, k_w = jax.random.split(key, 4)

    img = jax.random.normal(k_img, (B, C, H, W), jnp.float32)
    pred = jax.random.normal(k_pred, (B, C, H, W), jnp.float32)
    target = jax.random.normal(k_tgt, (B, C, H, W), jnp.float32)

    # Deterministic linear-critic "Discriminator" over cat(pred, img): feature dim
    # = 2*C*H*W = 2048 (multiple of 128).
    F = 2 * C * H * W
    disc_w = 0.01 * jax.random.normal(k_w, (1, F), jnp.float32)

    args = types.SimpleNamespace(mode='conditional_gan', epochs=8,
                                 perceptual_loss=False, cuda=False)
    loss = LossGAN(args)

    # D phase
    adv_D, gp, _ = loss.forward('D', disc_w, img, pred, target, epoch_id=0)
    # G phase, early epoch -> L1 pixel loss
    adv_G, pix_l1, perc = loss.forward('G', disc_w, img, pred, target, epoch_id=0)
    # G phase, later epoch -> MSE pixel loss
    _, pix_mse, _ = loss.forward('G', disc_w, img, pred, target, epoch_id=5)
    # eval phase
    pix_eval = loss.forward('eval', disc_w, img, pred, target, epoch_id=0)

    jax.block_until_ready((adv_D, gp, adv_G, pix_l1, pix_mse, pix_eval))

    # Pure-JAX reference (linear, bias-free critic over cat(pred, img)).
    pf = pred.reshape(B, -1)
    tf = target.reshape(B, -1)
    imf = img.reshape(B, -1)
    wp, wi = disc_w[0, :pf.shape[1]], disc_w[0, pf.shape[1]:]
    d_pred = pf @ wp + imf @ wi
    d_tgt = tf @ wp + imf @ wi
    ref_adv_D = -jnp.mean(d_tgt) + jnp.mean(d_pred)
    ref_gp = (jnp.sqrt(jnp.sum(jnp.square(
        jnp.broadcast_to(disc_w, (B, disc_w.shape[1]))))) - 1.0) ** 2
    ref_adv_G = -jnp.mean(d_pred)
    ref_l1 = jnp.mean(jnp.abs(pred - target))
    ref_mse = jnp.mean((pred - target) ** 2)

    checks = [
        jnp.allclose(adv_D, ref_adv_D, rtol=1e-3, atol=1e-4),
        jnp.allclose(gp, ref_gp, rtol=1e-3, atol=1e-4),
        jnp.allclose(adv_G, ref_adv_G, rtol=1e-3, atol=1e-4),
        jnp.allclose(pix_l1, ref_l1, rtol=1e-3, atol=1e-4),
        jnp.allclose(pix_mse, ref_mse, rtol=1e-3, atol=1e-4),
        jnp.allclose(pix_eval, ref_mse, rtol=1e-3, atol=1e-4),
    ]
    assert all(bool(c) for c in checks), "mismatch vs pure-JAX reference"
    print("KERNEL_OK")
</pallas_src>

<mosaic_0001>
module attributes {stable_mosaic.version = 11 : i64} {
  func.func @_adv_d_kernel(%arg0: i32, %arg1: i32, %arg2: memref<2x8x128xf32, #tpu.memory_space<vmem>>, %arg3: memref<2x8x128xf32, #tpu.memory_space<vmem>>, %arg4: memref<2x8x128xf32, #tpu.memory_space<vmem>>, %arg5: memref<1x8x128xf32, #tpu.memory_space<vmem>>, %arg6: memref<1x8x128xf32, #tpu.memory_space<vmem>>) attributes {dimension_semantics = [#tpu.dimension_semantics<parallel>, #tpu.dimension_semantics<arbitrary>], iteration_bounds = array<i64: 1, 1>, scalar_prefetch = 0 : i64, scratch_operands = 0 : i64, tpu.core_type = #tpu.core_type<tc>, window_params = [{transform_indices = @transform_0, window_bounds = array<i64: 2, 8, 128>}, {transform_indices = @transform_1, window_bounds = array<i64: 2, 8, 128>}, {transform_indices = @transform_2, window_bounds = array<i64: 2, 8, 128>}, {transform_indices = @transform_3, window_bounds = array<i64: 1, 8, 128>}, {transform_indices = @transform_4, window_bounds = array<i64: 1, 8, 128>}]} {
    %c0_i32 = arith.constant 0 : i32
    %0 = arith.cmpi eq, %arg1, %c0_i32 : i32
    %1 = arith.extui %0 : i1 to i32
    %c0_i32_0 = arith.constant 0 : i32
    %2 = arith.cmpi ne, %1, %c0_i32_0 : i32
    scf.if %2 {
      %cst_22 = arith.constant 0.000000e+00 : f32
      %23 = vector.broadcast %cst_22 : f32 to vector<1x8x128xf32>
      %c0_23 = arith.constant 0 : index
      %c0_24 = arith.constant 0 : index
      %c0_25 = arith.constant 0 : index
      %24 = vector.load %arg5[%c0_23, %c0_24, %c0_25] : memref<1x8x128xf32, #tpu.memory_space<vmem>>, vector<1x8x128xf32>
      tpu.vector_store %arg5[%c0_23, %c0_24, %c0_25], %23 {strides = array<i32>} : memref<1x8x128xf32, #tpu.memory_space<vmem>>, vector<1x8x128xf32>,
      %cst_26 = arith.constant 0.000000e+00 : f32
      %25 = vector.broadcast %cst_26 : f32 to vector<1x8x128xf32>
      %c0_27 = arith.constant 0 : index
      %c0_28 = arith.constant 0 : index
      %c0_29 = arith.constant 0 : index
      %26 = vector.load %arg6[%c0_27, %c0_28, %c0_29] : memref<1x8x128xf32, #tpu.memory_space<vmem>>, vector<1x8x128xf32>
      tpu.vector_store %arg6[%c0_27, %c0_28, %c0_29], %25 {strides = array<i32>} : memref<1x8x128xf32, #tpu.memory_space<vmem>>, vector<1x8x128xf32>,
    } else {
    }
    %c0 = arith.constant 0 : index
    %c0_1 = arith.constant 0 : index
    %c0_2 = arith.constant 0 : index
    %3 = vector.load %arg2[%c0, %c0_1, %c0_2] : memref<2x8x128xf32, #tpu.memory_space<vmem>>, vector<2x8x128xf32>
    %c0_3 = arith.constant 0 : index
    %c0_4 = arith.constant 0 : index
    %c0_5 = arith.constant 0 : index
    %4 = vector.load %arg3[%c0_3, %c0_4, %c0_5] : memref<2x8x128xf32, #tpu.memory_space<vmem>>, vector<2x8x128xf32>
    %c0_6 = arith.constant 0 : index
    %c0_7 = arith.constant 0 : index
    %c0_8 = arith.constant 0 : index
    %5 = vector.load %arg4[%c0_6, %c0_7, %c0_8] : memref<2x8x128xf32, #tpu.memory_space<vmem>>, vector<2x8x128xf32>
    %c0_9 = arith.constant 0 : index
    %c0_10 = arith.constant 0 : index
    %c0_11 = arith.constant 0 : index
    %6 = vector.load %arg5[%c0_9, %c0_10, %c0_11] : memref<1x8x128xf32, #tpu.memory_space<vmem>>, vector<1x8x128xf32>
    %7 = arith.subf %3, %4 : vector<2x8x128xf32>
    %8 = vector.extract_strided_slice %5 {offsets = [0, 0, 0], sizes = [1, 8, 128], strides = [1, 1, 1]} : vector<2x8x128xf32> to vector<1x8x128xf32>
    %9 = vector.shape_cast %8 : vector<1x8x128xf32> to vector<8x128xf32>
    %10 = vector.shape_cast %9 : vector<8x128xf32> to vector<1x8x128xf32>
    %11 = vector.broadcast %10 : vector<1x8x128xf32> to vector<2x8x128xf32>
    %12 = arith.mulf %7, %11 : vector<2x8x128xf32>
    %cst = arith.constant dense<0.000000e+00> : vector<8x128xf32>
    %13 = vector.multi_reduction <add>, %12, %cst [0] : vector<2x8x128xf32> to vector<8x128xf32>
    %14 = vector.shape_cast %13 : vector<8x128xf32> to vector<1x8x128xf32>
    %15 = arith.addf %6, %14 : vector<1x8x128xf32>
    %c0_12 = arith.constant 0 : index
    %c0_13 = arith.constant 0 : index
    %c0_14 = arith.constant 0 : index
    %16 = vector.load %arg5[%c0_12, %c0_13, %c0_14] : memref<1x8x128xf32, #tpu.memory_space<vmem>>, vector<1x8x128xf32>
    tpu.vector_store %arg5[%c0_12, %c0_13, %c0_14], %15 {strides = array<i32>} : memref<1x8x128xf32, #tpu.memory_space<vmem>>, vector<1x8x128xf32>,
    %c0_15 = arith.constant 0 : index
    %c0_16 = arith.constant 0 : index
    %c0_17 = arith.constant 0 : index
    %17 = vector.load %arg6[%c0_15, %c0_16, %c0_17] : memref<1x8x128xf32, #tpu.memory_space<vmem>>, vector<1x8x128xf32>
    %18 = arith.mulf %5, %5 : vector<2x8x128xf32>
    %cst_18 = arith.constant dense<0.000000e+00> : vector<8x128xf32>
    %19 = vector.multi_reduction <add>, %18, %cst_18 [0] : vector<2x8x128xf32> to vector<8x128xf32>
    %20 = vector.shape_cast %19 : vector<8x128xf32> to vector<1x8x128xf32>
    %21 = arith.addf %17, %20 : vector<1x8x128xf32>
    %c0_19 = arith.constant 0 : index
    %c0_20 = arith.constant 0 : index
    %c0_21 = arith.constant 0 : index
    %22 = vector.load %arg6[%c0_19, %c0_20, %c0_21] : memref<1x8x128xf32, #tpu.memory_space<vmem>>, vector<1x8x128xf32>
    tpu.vector_store %arg6[%c0_19, %c0_20, %c0_21], %21 {strides = array<i32>} : memref<1x8x128xf32, #tpu.memory_space<vmem>>, vector<1x8x128xf32>,
    return
  }
  func.func @transform_0(%arg0: i32, %arg1: i32) -> (i32, i32, i32) {
    %c1_i32 = arith.constant 1 : i32
    %0 = arith.muli %arg0, %c1_i32 : i32
    %1 = arith.addi %0, %arg1 : i32
    %c0_i32 = arith.constant 0 : i32
    %c0_i32_0 = arith.constant 0 : i32
    %c0_i32_1 = arith.constant 0 : i32
    return %c0_i32, %1, %c0_i32_0 : i32, i32, i32
  }
  func.func @transform_1(%arg0: i32, %arg1: i32) -> (i32, i32, i32) {
    %c1_i32 = arith.constant 1 : i32
    %0 = arith.muli %arg0, %c1_i32 : i32
    %1 = arith.addi %0, %arg1 : i32
    %c0_i32 = arith.constant 0 : i32
    %c0_i32_0 = arith.constant 0 : i32
    %c0_i32_1 = arith.constant 0 : i32
    return %c0_i32, %1, %c0_i32_0 : i32, i32, i32
  }
  func.func @transform_2(%arg0: i32, %arg1: i32) -> (i32, i32, i32) {
    %c1_i32 = arith.constant 1 : i32
    %0 = arith.muli %arg0, %c1_i32 : i32
    %1 = arith.addi %0, %arg1 : i32
    %c0_i32 = arith.constant 0 : i32
    %c0_i32_0 = arith.constant 0 : i32
    %c0_i32_1 = arith.constant 0 : i32
    return %c0_i32, %1, %c0_i32_0 : i32, i32, i32
  }
  func.func @transform_3(%arg0: i32, %arg1: i32) -> (i32, i32, i32) {
    %c0_i32 = arith.constant 0 : i32
    %c0_i32_0 = arith.constant 0 : i32
    %c0_i32_1 = arith.constant 0 : i32
    return %arg0, %c0_i32, %c0_i32_0 : i32, i32, i32
  }
  func.func @transform_4(%arg0: i32, %arg1: i32) -> (i32, i32, i32) {
    %c0_i32 = arith.constant 0 : i32
    %c0_i32_0 = arith.constant 0 : i32
    %c0_i32_1 = arith.constant 0 : i32
    return %arg0, %c0_i32, %c0_i32_0 : i32, i32, i32
  }
}

</mosaic_0001>

<bundles_post_ra>
// kernel: tpu_custom_call.1
= control target key start
LH: loop header
LB: loop body
LE: loop exit
PB: predicated region body
PF: predicated region fallthrough
CT: control target
= control target key end

     0   :  { %10 = vsyncpa [#allocation3], 0  ;;  %s361_s0 = inlined_call_operand.hbm [shape: f32[2,8,128], index: 0, kind: input, shape index: {}]   ;;  %s362_s1 = inlined_call_operand.hbm [shape: f32[2,8,128], index: 1, kind: input, shape index: {}]   ;;  %s363_s2 = inlined_call_operand.hbm [shape: f32[2,8,128], index: 2, kind: input, shape index: {}]   ;;  %s364_s3 = inlined_call_operand.hbm [shape: f32[1,8,128], index: 3, kind: output, shape index: {0}]   ;;  %s365_s4 = inlined_call_operand.hbm [shape: f32[1,8,128], index: 4, kind: output, shape index: {1}]  }
   0x1   :  { %11 = vsyncpa [#allocation6], 0 }
   0x2   :  { %12 = vsyncpa [#allocation4], 0 }
   0x3   :  { %13 = vsyncpa [#allocation10], 0  ;;  %s253_s15 = smov [#allocation5]   ;;  %s254_s17 = smov [#allocation2]  }
   0x4   :  { %s37_s16 = sshll.u32 %s253_s15, 4  ;;  %s22_s18 = sshll.u32 %s254_s17, 4  ;;  %s38_s16 = int_to_ptr.vmem [resolvable:$true] %s37_s16  ;;  %s285_s18 = int_to_ptr.vmem [resolvable:$true] %s22_s18 }
   0x5   :  { %s135_s21 = scalar_lea.hbm %s362_s1, 256 }
   0x6   :  { %p136_p0 = scmp.ne.s32.totalorder %s362_s1, %s135_s21  ;;  %p139_p1 = scmp.lt.u32.totalorder %s135_s21, %s362_s1 }
   0x8   :  { %p141_p2 = pnand %p139_p1, %p136_p0 }
   0xa   :  { %144 = shalt.err (!%p141_p2)
}
   0xb   :  { %s145_s26 = scalar_lea.vmem %s38_s16, 256  ;;  %p150_p4 = scmp.lt.s32.totalorder %s38_s16, %s38_s16 }
   0xc   :  { %p146_p3 = scmp.ne.s32.totalorder %s38_s16, %s145_s26  ;;  %p151_p5 = scmp.lt.s32.totalorder %s145_s26, %s145_s26 }
   0xe   :  { %p152_p6 = por %p151_p5, %p150_p4 }
  0x10   :  { %p153_p7 = pnand %p152_p6, %p146_p3 }
  0x12   :  { %156 = shalt.err (!%p153_p7)
}
  0x13   :  { %s255_s27 = smov 128   ;;  %s256_s28 = smov 8  }
  0x14   :  { %43 = dma.hbm_to_vmem [thread:$0]  %s362_s1, 256, %s38_s16, [#allocation6], %s255_s27, %s255_s27, %s256_s28  }
  0x15   :  { %s157_s7 = scalar_lea.hbm %s361_s0, 256 }
  0x16   :  { %p158_p8 = scmp.ne.s32.totalorder %s361_s0, %s157_s7  ;;  %p161_p9 = scmp.lt.u32.totalorder %s157_s7, %s361_s0 }
  0x18   :  { %p163_p10 = pnand %p161_p9, %p158_p8 }
  0x1a   :  { %166 = shalt.err (!%p163_p10)
}
  0x1b   :  { %s167_s12 = scalar_lea.vmem %s285_s18, 256  ;;  %p172_p12 = scmp.lt.s32.totalorder %s285_s18, %s285_s18 }
  0x1c   :  { %p168_p11 = scmp.ne.s32.totalorder %s285_s18, %s167_s12  ;;  %p173_p13 = scmp.lt.s32.totalorder %s167_s12, %s167_s12 }
  0x1e   :  { %p174_p0 = por %p173_p13, %p172_p12 }
  0x20   :  { %p175_p1 = pnand %p174_p0, %p168_p11 }
  0x22   :  { %178 = shalt.err (!%p175_p1)
}
  0x23   :  { %28 = dma.hbm_to_vmem [thread:$0]  %s361_s0, 256, %s285_s18, [#allocation3], %s255_s27, %s255_s27, %s256_s28  }
  0x24   :  { %s257_s14 = smov [#allocation7]   ;;  %s179_s19 = scalar_lea.hbm %s363_s2, 256 }
  0x25   :  { %s52_s15 = sshll.u32 %s257_s14, 4  ;;  %p180_p2 = scmp.ne.s32.totalorder %s363_s2, %s179_s19  ;;  %s53_s15 = int_to_ptr.vmem [resolvable:$true] %s52_s15 }
  0x26   :  { %p183_p3 = scmp.lt.u32.totalorder %s179_s19, %s363_s2 }
  0x28   :  { %p185_p4 = pnand %p183_p3, %p180_p2 }
  0x2a   :  { %188 = shalt.err (!%p185_p4)
}
  0x2b   :  { %s189_s24 = scalar_lea.vmem %s53_s15, 256  ;;  %p194_p6 = scmp.lt.s32.totalorder %s53_s15, %s53_s15 }
  0x2c   :  { %p190_p5 = scmp.ne.s32.totalorder %s53_s15, %s189_s24  ;;  %p195_p7 = scmp.lt.s32.totalorder %s189_s24, %s189_s24 }
  0x2e   :  { %p196_p8 = por %p195_p7, %p194_p6 }
  0x30   :  { %p197_p9 = pnand %p196_p8, %p190_p5 }
  0x32   :  { %200 = shalt.err (!%p197_p9)
}
  0x33   :  { %58 = dma.hbm_to_vmem [thread:$0]  %s363_s2, 256, %s53_s15, [#allocation6], %s255_s27, %s255_s27, %s256_s28  }
  0x34   :  { %245 = dma.done.wait [#allocation3], 256  }
  0x35   :  { %246 = vsyncadd [#allocation3], 4294967040 }
  0x36   :  { %247 = dma.done.wait [#allocation6], 512  }
  0x37   :  { %248 = vsyncadd [#allocation6], 4294966784  ;;  %v77_v0 = vld [vmem:[#allocation2] sm:$0xff]  ;;  %v78_v1 = vld [vmem:[#allocation2 + $0x8] sm:$0xff]  ;;  %s258_s25 = smov [#allocation9]   ;;  %s259_s2 = smov [#allocation8]  }
  0x38   :  { %v79_v2 = vld [vmem:[#allocation5] sm:$0xff]  ;;  %v80_v3 = vld [vmem:[#allocation5 + $0x8] sm:$0xff]  ;;  %v81_v4 = vld [vmem:[#allocation7] sm:$0xff]  ;;  %s113_s26 = sshll.u32 %s258_s25, 4  ;;  %s103_s27 = sshll.u32 %s259_s2, 4  ;;  %s114_s26 = int_to_ptr.vmem [resolvable:$true] %s113_s26  ;;  %s104_s27 = int_to_ptr.vmem [resolvable:$true] %s103_s27 }
  0x39   :  { %v84_v5 = vsub.f32 %v77_v0, %v79_v2  ;;  %v82_v6 = vld [vmem:[#allocation7 + $0x8] sm:$0xff]  ;;  %v85_v7 = vsub.f32 %v78_v1, %v80_v3  ;;  %v92_v8 = vmul.f32 %v81_v4, %v81_v4  ;;  %s201_s28 = scalar_lea.vmem %s114_s26, 128  ;;  %p206_p11 = scmp.lt.s32.totalorder %s114_s26, %s114_s26 }
  0x3a   :  { %v93_v9 = vmul.f32 %v82_v6, %v82_v6  ;;  %p202_p10 = scmp.ne.s32.totalorder %s114_s26, %s201_s28  ;;  %p207_p12 = scmp.lt.s32.totalorder %s201_s28, %s201_s28 }
  0x3b   :  { %v86_v10 = vmul.f32 %v84_v5, %v81_v4  ;;  %v87_v11 = vmul.f32 %v85_v7, %v81_v4 }
  0x3c   :  { %v94_v12 = vadd.f32 %v93_v9, %v92_v8  ;;  %p208_p13 = por %p207_p12, %p206_p11 }
  0x3d   :  { %v88_v13 = vadd.f32 %v87_v11, %v86_v10 }
  0x3e   :  { %96 = vst [vmem:[#allocation9] sm:$0xff] %v94_v12  ;;  %p209_p0 = pnand %p208_p13, %p202_p10 }
  0x40   :  { %212 = shalt.err (!%p209_p0)
}
  0x41   :  { %s213_s5 = scalar_lea.hbm %s365_s4, 128 }
  0x42   :  { %p214_p1 = scmp.ne.s32.totalorder %s365_s4, %s213_s5  ;;  %p217_p2 = scmp.lt.u32.totalorder %s213_s5, %s365_s4 }
  0x44   :  { %p219_p3 = pnand %p217_p2, %p214_p1 }
  0x46   :  { %222 = shalt.err (!%p219_p3)
}
  0x47   :  { %116 = dma.vmem_to_hbm [thread:$0]  %s114_s26, 128, %s365_s4, [#allocation10]   ;;  %90 = vst [vmem:[#allocation8] sm:$0xff] %v88_v13 }
  0x48   :  { %s223_s12 = scalar_lea.vmem %s104_s27, 128  ;;  %p228_p5 = scmp.lt.s32.totalorder %s104_s27, %s104_s27 }
  0x49   :  { %p224_p4 = scmp.ne.s32.totalorder %s104_s27, %s223_s12  ;;  %p229_p6 = scmp.lt.s32.totalorder %s223_s12, %s223_s12 }
  0x4b   :  { %p230_p7 = por %p229_p6, %p228_p5 }
  0x4d   :  { %p231_p8 = pnand %p230_p7, %p224_p4 }
  0x4f   :  { %234 = shalt.err (!%p231_p8)
}
  0x50   :  { %s235_s14 = scalar_lea.hbm %s364_s3, 128 }
  0x51   :  { %p236_p9 = scmp.ne.s32.totalorder %s364_s3, %s235_s14  ;;  %p239_p10 = scmp.lt.u32.totalorder %s235_s14, %s364_s3 }
  0x53   :  { %p241_p11 = pnand %p239_p10, %p236_p9 }
  0x55   :  { %244 = shalt.err (!%p241_p11)
}
  0x56   :  { %106 = dma.vmem_to_hbm [thread:$0]  %s104_s27, 128, %s364_s3, [#allocation4]  }
  0x57   :  { %249 = dma.done.wait [#allocation4], 128  }
  0x58   :  { %250 = vsyncadd [#allocation4], 4294967168 }
  0x59   :  { %251 = dma.done.wait [#allocation10], 128  }
  0x5a   :  { %252 = vsyncadd [#allocation10], 4294967168 }
  0x5b   :  { %123 = vsyncpa [#allocation3], 1 }
  0x5c   :  { %124 = vsyncpa [#allocation6], 1 }
  0x5d   :  { %125 = vsyncpa [#allocation4], 1 }
  0x5e   :  { %126 = vsyncpa [#allocation10], 1 }

</bundles_post_ra>
